<compile_context>
chip_gen: v5e
topology: v5e:2x2
jax: 0.10.0
libtpu: 0.0.40
codegen_flags: <defaults>
</compile_context>

<pallas_src>
import functools

import jax
import jax.numpy as jnp
from jax import lax
from jax.experimental import pallas as pl
from jax.experimental.pallas import tpu as pltpu


def _round_up(n, m):
    return ((n + m - 1) // m) * m


def _vmem_limit_bytes():
    # Larger scoped limit where physical VMEM allows (v5e/v6e: 128 MiB),
    # conservative on v7x (64 MiB physical).
    try:
        cap = pltpu.get_tpu_info().vmem_capacity_bytes
        return int(min(max(cap * 3 // 4, 32 * 1024 * 1024), 96 * 1024 * 1024))
    except Exception:
        return 64 * 1024 * 1024


# ----------------------------------------------------------------------------
# Kernel 1: freq-tiled  DFT -> Gaussian filter -> PLV gram accumulation
#   grid = (batch_tiles [parallel], freq_tiles [arbitrary])
#   outputs: rp (NF, B, C, C)  and  A = ui@ur^T (NF, B, C, C)
# ----------------------------------------------------------------------------
def _plv_gram_kernel(x_ref, dft_ref, fr_ref, fi_ref, rp_ref, aa_ref,
                     acc_r_ref, acc_a_ref, *,
                     n_filters, batch_tile, n_chans, f_tile, plv_eps=1e-6):
    j = pl.program_id(1)

    @pl.when(j == 0)
    def _init():
        acc_r_ref[...] = jnp.zeros_like(acc_r_ref)
        acc_a_ref[...] = jnp.zeros_like(acc_a_ref)

    # --- Stage 1: partial rfft for this frequency tile: one bf16 MXU matmul.
    # x block is (M, T) with M = bt*C (batch folded into the MXU M dim);
    # dft block is per-tile [cos | -sin] of shape (T, 2*f_tile).
    xb = x_ref[...].astype(jnp.bfloat16)
    xri = jnp.dot(xb, dft_ref[...], preferred_element_type=jnp.float32)
    xr = xri[:, :f_tile]                      # lane-aligned slices (128-mult)
    xi = xri[:, f_tile:]

    dims = (((1,), (1,)), ((), ()))           # contract over freq, no transpose

    # --- Stage 2: per-filter elementwise + batch-folded grams.
    # fori_loop keeps only (M, f_tile)-sized intermediates live per filter.
    # NOTE: torch multiplies real*real, imag*imag separately (not a complex
    # multiply) — reproduced literally.  Padded freq columns are exact zeros
    # in fr/fi, so ur/ui vanish there and contribute nothing to the grams.
    def per_filter(f, carry):
        fr_v = fr_ref[f]                      # (1, f_tile)
        fi_v = fi_ref[f]
        yr = xr * fr_v
        yi = xi * fi_v
        mag = jnp.sqrt(yr * yr + yi * yi)
        # TODO(synk): eps placement u = z/(|z|+1e-6) assumed to match
        # braindecode.functional.plv_time; verify before changing.
        inv = pl.reciprocal(mag + plv_eps, approx=True)     # EUP slot (~free)
        ur = yr * inv
        ui = yi * inv
        # 3 matmuls (f32 accuracy): rp-partial and A-partial for this tile.
        gr = (lax.dot_general(ur, ur, dims, preferred_element_type=jnp.float32)
              + lax.dot_general(ui, ui, dims,
                                preferred_element_type=jnp.float32))
        ga = lax.dot_general(ui, ur, dims, preferred_element_type=jnp.float32)
        acc_r_ref[f, :, :] = acc_r_ref[f, :, :] + gr
        acc_a_ref[f, :, :] = acc_a_ref[f, :, :] + ga
        return carry

    lax.fori_loop(0, n_filters, per_filter, 0)

    # --- Finalize: extract per-batch diagonal CxC blocks (static slices only).
    @pl.when(j == pl.num_programs(1) - 1)
    def _finalize():
        for f in range(n_filters):
            for b in range(batch_tile):
                lo = b * n_chans
                rp_ref[f, b] = acc_r_ref[f, lo:lo + n_chans, lo:lo + n_chans]
                aa_ref[f, b] = acc_a_ref[f, lo:lo + n_chans, lo:lo + n_chans]


# ----------------------------------------------------------------------------
# Kernel 2: BatchNorm1d (training batch stats, affine=False) + Linear (padded)
# ----------------------------------------------------------------------------
def _bn_linear_kernel(feat_ref, wt_ref, b_ref, out_ref, *, bn_eps=1e-5):
    # NOTE: batch statistics are correct only because the whole batch is in
    # one block (grid=(1,)). Do not tile the batch axis of this kernel.
    x = feat_ref[...]                                       # (B, Kpad)
    mean = jnp.mean(x, axis=0, keepdims=True)
    var = jnp.mean((x - mean) ** 2, axis=0, keepdims=True)  # biased, like BN
    xn = (x - mean) * jax.lax.rsqrt(var + bn_eps)
    out_ref[...] = (jnp.dot(xn, wt_ref[...],
                            preferred_element_type=jnp.float32) + b_ref[...])


# ----------------------------------------------------------------------------
# Parameter / filter-bank construction (plain JAX, deterministic)
# ----------------------------------------------------------------------------
def build_filters(n_times, sfreq, f_mean, bandwidth, shape, group_delay,
                  clamp_f_mean=(1.0, 45.0)):
    half = sfreq / 2.0
    n_half = n_times // 2
    n_range = jnp.concatenate(
        [jnp.arange(n_half, dtype=jnp.float32) * (sfreq / n_times),
         jnp.array([half], dtype=jnp.float32)]) / half                # (F,)

    f_mean = jnp.clip(jnp.asarray(f_mean, jnp.float32) / half,
                      clamp_f_mean[0] / half, clamp_f_mean[1] / half)
    bw = jnp.clip(jnp.asarray(bandwidth, jnp.float32) / half, 1.0 / half, 1.0)
    shp = jnp.clip(jnp.asarray(shape, jnp.float32), 2.0, 3.0)
    gd = jnp.asarray(group_delay, jnp.float32) / 1000.0

    beta = shp * 8.0 - 14.0
    log2 = jnp.log(jnp.float32(2.0))
    scale = bw[:, None] / (2.0 * log2 ** (1.0 / beta[:, None]))
    mag = jnp.exp(-(((jnp.abs(n_range[None, :] - f_mean[:, None]) + 1e-8)
                     / scale) ** beta[:, None]))                      # (NF, F)
    mag = mag / jnp.max(mag, axis=-1, keepdims=True)

    phase = jnp.linspace(0.0, sfreq, n_half + 1, dtype=jnp.float32)
    pha = -gd[:, None] * phase[None, :] * jnp.pi
    filt_r = mag * jnp.cos(pha)
    filt_i = mag * jnp.sin(pha)
    return filt_r.astype(jnp.float32), filt_i.astype(jnp.float32)


def build_dft_matrix_tiled(n_times, n_freq, f_tile, n_tiles):
    """Per-tile [cos | -sin] rfft matrix, (T, n_tiles*2*f_tile), bf16.

    Tile j occupies columns [j*2*f_tile, (j+1)*2*f_tile): first f_tile columns
    hold cos for freqs [j*f_tile, (j+1)*f_tile), next f_tile hold -sin.
    Padded frequency columns are exact zeros.  Angles built from exact integer
    (t*k) mod T to avoid f32 range-reduction error at large n_times.
    """
    f_pad = n_tiles * f_tile
    t = jnp.arange(n_times, dtype=jnp.int32)[:, None]
    k = jnp.arange(n_freq, dtype=jnp.int32)[None, :]
    m = (t * k) % n_times
    ang = (2.0 * jnp.pi / float(n_times)) * m.astype(jnp.float32)
    cos_full = jnp.zeros((n_times, f_pad), jnp.float32).at[:, :n_freq].set(
        jnp.cos(ang))
    msin_full = jnp.zeros((n_times, f_pad), jnp.float32).at[:, :n_freq].set(
        -jnp.sin(ang))
    cos_t = cos_full.reshape(n_times, n_tiles, 1, f_tile)
    msin_t = msin_full.reshape(n_times, n_tiles, 1, f_tile)
    dft = jnp.concatenate([cos_t, msin_t], axis=2)
    return dft.reshape(n_times, n_tiles * 2 * f_tile).astype(jnp.bfloat16)


def _pick_batch_tile(batch, n_chans, target_rows=256):
    """Pick a batch tile bt such that:
      * bt divides batch,
      * the block sublane dim bt*C is legal (multiple of 8, or bt == batch),
      * bt*C is close to target_rows (v6e/v7x MXU: 256 rows; use 128 for v5e),
      * when possible, >= 2 batch-grid steps remain (keeps both v7x TCs busy).
    """
    legal = [d for d in range(1, batch + 1)
             if batch % d == 0 and ((d * n_chans) % 8 == 0 or d == batch)]
    fitting = [d for d in legal if d * n_chans <= target_rows]
    if fitting:
        multi = [d for d in fitting if batch // d >= 2]
        pool = multi if multi else fitting
        return max(pool)
    return min(legal)


# ----------------------------------------------------------------------------
# Full EEGMiner forward (method='plv')
# ----------------------------------------------------------------------------
def eegminer_plv_forward(x, filt_r_pad, filt_i_pad, dft_tiled, w_t, bias,
                         n_filters, f_tile):
    B, C, T = x.shape
    n_freq = T // 2 + 1
    f_pad = filt_r_pad.shape[-1]
    n_freq_tiles = f_pad // f_tile
    n_out = w_t.shape[1]

    bt = _pick_batch_tile(B, C)
    m_rows = bt * C
    grid = (B // bt, n_freq_tiles)

    # Fold batch into the matmul M dimension (free XLA reshape outside kernel).
    x2 = x.reshape(B * C, T).astype(jnp.float32)
    fr = filt_r_pad.reshape(n_filters, 1, f_pad)
    fi = filt_i_pad.reshape(n_filters, 1, f_pad)

    rp, aa = pl.pallas_call(
        functools.partial(_plv_gram_kernel, n_filters=n_filters,
                          batch_tile=bt, n_chans=C, f_tile=f_tile),
        out_shape=(jax.ShapeDtypeStruct((n_filters, B, C, C), jnp.float32),
                   jax.ShapeDtypeStruct((n_filters, B, C, C), jnp.float32)),
        grid=grid,
        in_specs=[
            pl.BlockSpec((m_rows, T), lambda i, j: (i, 0)),
            pl.BlockSpec((T, 2 * f_tile), lambda i, j: (0, j)),
            pl.BlockSpec((n_filters, 1, f_tile), lambda i, j: (0, 0, j)),
            pl.BlockSpec((n_filters, 1, f_tile), lambda i, j: (0, 0, j)),
        ],
        out_specs=(
            pl.BlockSpec((n_filters, bt, C, C), lambda i, j: (0, i, 0, 0)),
            pl.BlockSpec((n_filters, bt, C, C), lambda i, j: (0, i, 0, 0)),
        ),
        scratch_shapes=[
            pltpu.VMEM((n_filters, m_rows, m_rows), jnp.float32),
            pltpu.VMEM((n_filters, m_rows, m_rows), jnp.float32),
        ],
        compiler_params=pltpu.CompilerParams(
            dimension_semantics=("parallel", "arbitrary"),
            vmem_limit_bytes=_vmem_limit_bytes()),
    )(x2, dft_tiled, fr, fi)

    # Tiny PLV epilogue + triu(i<j) gather (XLA glue — tensors are small).
    ip = aa - jnp.swapaxes(aa, -1, -2)
    plv = jnp.sqrt(rp * rp + ip * ip) * (1.0 / float(n_freq))  # (NF, B, C, C)
    iu0, iu1 = jnp.triu_indices(C, k=1)
    feats = jnp.transpose(plv, (1, 2, 3, 0))[:, iu0, iu1, :]   # (B, n_pairs, NF)
    n_features = feats.shape[1] * n_filters
    feats = feats.reshape(B, n_features).astype(jnp.float32)

    # Pad K and N dims to 128 lanes (zero padding is exact for BN + Linear).
    k_pad = _round_up(n_features, 128)
    n_pad = _round_up(n_out, 128)
    feats_p = jnp.pad(feats, ((0, 0), (0, k_pad - n_features)))
    w_p = jnp.pad(w_t, ((0, k_pad - n_features), (0, n_pad - n_out)))
    b_p = jnp.pad(bias, ((0, 0), (0, n_pad - n_out)))

    out = pl.pallas_call(
        _bn_linear_kernel,
        out_shape=jax.ShapeDtypeStruct((B, n_pad), jnp.float32),
        grid=(1,),
        in_specs=[
            pl.BlockSpec((B, k_pad), lambda i: (0, 0)),
            pl.BlockSpec((k_pad, n_pad), lambda i: (0, 0)),
            pl.BlockSpec((1, n_pad), lambda i: (0, 0)),
        ],
        out_specs=pl.BlockSpec((B, n_pad), lambda i: (0, 0)),
        compiler_params=pltpu.CompilerParams(
            dimension_semantics=("arbitrary",)),
    )(feats_p, w_p, b_p)
    return out[:, :n_out]


if __name__ == "__main__":
    # Small configuration consistent with the module.
    batch, n_chans, n_times = 2, 4, 16
    sfreq = 16.0
    n_outputs = 3
    filter_f_mean = (23.0, 23.0)
    filter_bandwidth = (44.0, 44.0)
    filter_shape = (2.0, 2.0)
    group_delay = (20.0, 20.0)
    n_filters = len(filter_f_mean)
    n_features = n_filters * n_chans * (n_chans - 1) // 2

    key = jax.random.PRNGKey(0)
    kx, kw = jax.random.split(key)
    x = jax.random.normal(kx, (batch, n_chans, n_times), dtype=jnp.float32)

    # Deterministic parameter init (Linear: U(-1/sqrt(fan_in), ...), bias=0).
    bound = 1.0 / float(n_features) ** 0.5
    w = jax.random.uniform(kw, (n_outputs, n_features), jnp.float32,
                           minval=-bound, maxval=bound)
    bias = jnp.zeros((1, n_outputs), jnp.float32)

    n_freq = n_times // 2 + 1
    f_tile = min(_round_up(n_freq, 128), 512)     # freq-tile width (lanes)
    f_pad = _round_up(n_freq, f_tile)
    n_tiles = f_pad // f_tile

    filt_r, filt_i = build_filters(n_times, sfreq, filter_f_mean,
                                   filter_bandwidth, filter_shape, group_delay)
    filt_r = jnp.pad(filt_r, ((0, 0), (0, f_pad - n_freq)))
    filt_i = jnp.pad(filt_i, ((0, 0), (0, f_pad - n_freq)))
    dft_tiled = build_dft_matrix_tiled(n_times, n_freq, f_tile, n_tiles)

    out = eegminer_plv_forward(x, filt_r, filt_i, dft_tiled, w.T, bias,
                               n_filters, f_tile)
    out = jax.block_until_ready(out)
    assert out.shape == (batch, n_outputs)
    assert bool(jnp.all(jnp.isfinite(out)))
    print("KERNEL_OK")
</pallas_src>

<mosaic_0001>
module attributes {stable_mosaic.version = 11 : i64} {
  func.func @_plv_gram_kernel(%arg0: i32, %arg1: i32, %arg2: memref<8x16xf32, #tpu.memory_space<vmem>>, %arg3: memref<16x256xbf16, #tpu.memory_space<vmem>>, %arg4: memref<2x1x128xf32, #tpu.memory_space<vmem>>, %arg5: memref<2x1x128xf32, #tpu.memory_space<vmem>>, %arg6: memref<2x2x4x4xf32, #tpu.memory_space<vmem>>, %arg7: memref<2x2x4x4xf32, #tpu.memory_space<vmem>>, %arg8: memref<2x8x8xf32, #tpu.memory_space<vmem>>, %arg9: memref<2x8x8xf32, #tpu.memory_space<vmem>>) attributes {dimension_semantics = [#tpu.dimension_semantics<parallel>, #tpu.dimension_semantics<arbitrary>], iteration_bounds = array<i64: 1, 1>, scalar_prefetch = 0 : i64, scratch_operands = 2 : i64, tpu.core_type = #tpu.core_type<tc>, window_params = [{transform_indices = @transform_0, window_bounds = array<i64: 8, 16>}, {transform_indices = @transform_1, window_bounds = array<i64: 16, 256>}, {transform_indices = @transform_2, window_bounds = array<i64: 2, 1, 128>}, {transform_indices = @transform_3, window_bounds = array<i64: 2, 1, 128>}, {transform_indices = @transform_4, window_bounds = array<i64: 2, 2, 4, 4>}, {transform_indices = @transform_5, window_bounds = array<i64: 2, 2, 4, 4>}]} {
    %c0_i32 = arith.constant 0 : i32
    %0 = arith.cmpi eq, %arg1, %c0_i32 : i32
    %1 = arith.extui %0 : i1 to i32
    %c0_i32_0 = arith.constant 0 : i32
    %2 = arith.cmpi ne, %1, %c0_i32_0 : i32
    scf.if %2 {
      %cst_8 = arith.constant 0.000000e+00 : f32
      %13 = vector.broadcast %cst_8 : f32 to vector<2x8x8xf32>
      %c0_9 = arith.constant 0 : index
      %c0_10 = arith.constant 0 : index
      %c0_11 = arith.constant 0 : index
      %14 = vector.load %arg8[%c0_9, %c0_10, %c0_11] : memref<2x8x8xf32, #tpu.memory_space<vmem>>, vector<2x8x8xf32>
      tpu.vector_store %arg8[%c0_9, %c0_10, %c0_11], %13 {strides = array<i32>} : memref<2x8x8xf32, #tpu.memory_space<vmem>>, vector<2x8x8xf32>,
      %cst_12 = arith.constant 0.000000e+00 : f32
      %15 = vector.broadcast %cst_12 : f32 to vector<2x8x8xf32>
      %c0_13 = arith.constant 0 : index
      %c0_14 = arith.constant 0 : index
      %c0_15 = arith.constant 0 : index
      %16 = vector.load %arg9[%c0_13, %c0_14, %c0_15] : memref<2x8x8xf32, #tpu.memory_space<vmem>>, vector<2x8x8xf32>
      tpu.vector_store %arg9[%c0_13, %c0_14, %c0_15], %15 {strides = array<i32>} : memref<2x8x8xf32, #tpu.memory_space<vmem>>, vector<2x8x8xf32>,
    } else {
    }
    %c0 = arith.constant 0 : index
    %c0_1 = arith.constant 0 : index
    %3 = vector.load %arg2[%c0, %c0_1] : memref<8x16xf32, #tpu.memory_space<vmem>>, vector<8x16xf32>
    %4 = arith.truncf %3 : vector<8x16xf32> to vector<8x16xbf16>
    %c0_2 = arith.constant 0 : index
    %c0_3 = arith.constant 0 : index
    %5 = vector.load %arg3[%c0_2, %c0_3] : memref<16x256xbf16, #tpu.memory_space<vmem>>, vector<16x256xbf16>
    %cst = arith.constant dense<0.000000e+00> : vector<8x256xf32>
    %6 = tpu.matmul %4, %5, %cst {dimension_numbers = #tpu.dot_dimension_numbers<[1], [0], [0], [1], [0, 0, 1, 1], [], []>} : vector<8x16xbf16>, vector<16x256xbf16>, vector<8x256xf32> -> vector<8x256xf32>
    %7 = vector.extract_strided_slice %6 {offsets = [0, 0], sizes = [8, 128], strides = [1, 1]} : vector<8x256xf32> to vector<8x128xf32>
    %8 = vector.extract_strided_slice %6 {offsets = [0, 128], sizes = [8, 128], strides = [1, 1]} : vector<8x256xf32> to vector<8x128xf32>
    %c0_i32_4 = arith.constant 0 : i32
    %c2_i32 = arith.constant 2 : i32
    %9 = arith.addi %c0_i32_4, %c2_i32 : i32
    %c1_i32 = arith.constant 1 : i32
    scf.for %arg10 = %c0_i32_4 to %9 step %c1_i32  : i32 {
      %13 = arith.index_cast %arg10 : i32 to index
      %c0_8 = arith.constant 0 : index
      %c0_9 = arith.constant 0 : index
      %14 = vector.load %arg4[%13, %c0_8, %c0_9] : memref<2x1x128xf32, #tpu.memory_space<vmem>>, vector<1x1x128xf32>
      %15 = vector.shape_cast %14 : vector<1x1x128xf32> to vector<1x128xf32>
      %16 = arith.index_cast %arg10 : i32 to index
      %c0_10 = arith.constant 0 : index
      %c0_11 = arith.constant 0 : index
      %17 = vector.load %arg5[%16, %c0_10, %c0_11] : memref<2x1x128xf32, #tpu.memory_space<vmem>>, vector<1x1x128xf32>
      %18 = vector.shape_cast %17 : vector<1x1x128xf32> to vector<1x128xf32>
      %19 = vector.broadcast %15 : vector<1x128xf32> to vector<8x128xf32>
      %20 = arith.mulf %7, %19 : vector<8x128xf32>
      %21 = vector.broadcast %18 : vector<1x128xf32> to vector<8x128xf32>
      %22 = arith.mulf %8, %21 : vector<8x128xf32>
      %23 = arith.mulf %20, %20 : vector<8x128xf32>
      %24 = arith.mulf %22, %22 : vector<8x128xf32>
      %25 = arith.addf %23, %24 : vector<8x128xf32>
      %26 = math.sqrt %25 : vector<8x128xf32>
      %cst_12 = arith.constant 9.99999997E-7 : f32
      %27 = vector.broadcast %cst_12 : f32 to vector<8x128xf32>
      %28 = arith.addf %26, %27 : vector<8x128xf32>
      %29 = tpu.reciprocal %28 {approx = true} : vector<8x128xf32> -> vector<8x128xf32>
      %30 = arith.mulf %20, %29 : vector<8x128xf32>
      %31 = arith.mulf %22, %29 : vector<8x128xf32>
      %cst_13 = arith.constant dense<0.000000e+00> : vector<8x8xf32>
      %32 = tpu.matmul %30, %30, %cst_13 {dimension_numbers = #tpu.dot_dimension_numbers<[1], [1], [0], [0], [0, 0, 1, 0], [], []>} : vector<8x128xf32>, vector<8x128xf32>, vector<8x8xf32> -> vector<8x8xf32>
      %cst_14 = arith.constant dense<0.000000e+00> : vector<8x8xf32>
      %33 = tpu.matmul %31, %31, %cst_14 {dimension_numbers = #tpu.dot_dimension_numbers<[1], [1], [0], [0], [0, 0, 1, 0], [], []>} : vector<8x128xf32>, vector<8x128xf32>, vector<8x8xf32> -> vector<8x8xf32>
      %34 = arith.addf %32, %33 : vector<8x8xf32>
      %cst_15 = arith.constant dense<0.000000e+00> : vector<8x8xf32>
      %35 = tpu.matmul %31, %30, %cst_15 {dimension_numbers = #tpu.dot_dimension_numbers<[1], [1], [0], [0], [0, 0, 1, 0], [], []>} : vector<8x128xf32>, vector<8x128xf32>, vector<8x8xf32> -> vector<8x8xf32>
      %36 = arith.index_cast %arg10 : i32 to index
      %c0_16 = arith.constant 0 : index
      %c0_17 = arith.constant 0 : index
      %37 = vector.load %arg8[%36, %c0_16, %c0_17] : memref<2x8x8xf32, #tpu.memory_space<vmem>>, vector<1x8x8xf32>
      %38 = vector.shape_cast %37 : vector<1x8x8xf32> to vector<8x8xf32>
      %39 = arith.addf %38, %34 : vector<8x8xf32>
      %40 = arith.index_cast %arg10 : i32 to index
      %c0_18 = arith.constant 0 : index
      %c0_19 = arith.constant 0 : index
      %41 = vector.load %arg8[%40, %c0_18, %c0_19] : memref<2x8x8xf32, #tpu.memory_space<vmem>>, vector<1x8x8xf32>
      %42 = vector.shape_cast %41 : vector<1x8x8xf32> to vector<8x8xf32>
      %43 = vector.shape_cast %39 : vector<8x8xf32> to vector<1x8x8xf32>
      tpu.vector_store %arg8[%40, %c0_18, %c0_19], %43 {strides = array<i32>} : memref<2x8x8xf32, #tpu.memory_space<vmem>>, vector<1x8x8xf32>,
      %44 = arith.index_cast %arg10 : i32 to index
      %c0_20 = arith.constant 0 : index
      %c0_21 = arith.constant 0 : index
      %45 = vector.load %arg9[%44, %c0_20, %c0_21] : memref<2x8x8xf32, #tpu.memory_space<vmem>>, vector<1x8x8xf32>
      %46 = vector.shape_cast %45 : vector<1x8x8xf32> to vector<8x8xf32>
      %47 = arith.addf %46, %35 : vector<8x8xf32>
      %48 = arith.index_cast %arg10 : i32 to index
      %c0_22 = arith.constant 0 : index
      %c0_23 = arith.constant 0 : index
      %49 = vector.load %arg9[%48, %c0_22, %c0_23] : memref<2x8x8xf32, #tpu.memory_space<vmem>>, vector<1x8x8xf32>
      %50 = vector.shape_cast %49 : vector<1x8x8xf32> to vector<8x8xf32>
      %51 = vector.shape_cast %47 : vector<8x8xf32> to vector<1x8x8xf32>
      tpu.vector_store %arg9[%48, %c0_22, %c0_23], %51 {strides = array<i32>} : memref<2x8x8xf32, #tpu.memory_space<vmem>>, vector<1x8x8xf32>,
    }
    %c2_i32_5 = arith.constant 2 : i32
    %c0_i32_6 = arith.constant 0 : i32
    %10 = arith.cmpi eq, %arg1, %c0_i32_6 : i32
    %11 = arith.extui %10 : i1 to i32
    %c0_i32_7 = arith.constant 0 : i32
    %12 = arith.cmpi ne, %11, %c0_i32_7 : i32
    scf.if %12 {
      %c0_8 = arith.constant 0 : index
      %c0_9 = arith.constant 0 : index
      %c0_10 = arith.constant 0 : index
      %13 = vector.load %arg8[%c0_8, %c0_9, %c0_10] : memref<2x8x8xf32, #tpu.memory_space<vmem>>, vector<1x4x4xf32>
      %14 = vector.shape_cast %13 : vector<1x4x4xf32> to vector<4x4xf32>
      %c0_11 = arith.constant 0 : index
      %c0_12 = arith.constant 0 : index
      %c0_13 = arith.constant 0 : index
      %c0_14 = arith.constant 0 : index
      %15 = vector.load %arg6[%c0_11, %c0_12, %c0_13, %c0_14] : memref<2x2x4x4xf32, #tpu.memory_space<vmem>>, vector<1x1x4x4xf32>
      %16 = vector.shape_cast %15 : vector<1x1x4x4xf32> to vector<4x4xf32>
      %17 = vector.shape_cast %14 : vector<4x4xf32> to vector<1x1x4x4xf32>
      tpu.vector_store %arg6[%c0_11, %c0_12, %c0_13, %c0_14], %17 {strides = array<i32>} : memref<2x2x4x4xf32, #tpu.memory_space<vmem>>, vector<1x1x4x4xf32>,
      %c0_15 = arith.constant 0 : index
      %c0_16 = arith.constant 0 : index
      %c0_17 = arith.constant 0 : index
      %18 = vector.load %arg9[%c0_15, %c0_16, %c0_17] : memref<2x8x8xf32, #tpu.memory_space<vmem>>, vector<1x4x4xf32>
      %19 = vector.shape_cast %18 : vector<1x4x4xf32> to vector<4x4xf32>
      %c0_18 = arith.constant 0 : index
      %c0_19 = arith.constant 0 : index
      %c0_20 = arith.constant 0 : index
      %c0_21 = arith.constant 0 : index
      %20 = vector.load %arg7[%c0_18, %c0_19, %c0_20, %c0_21] : memref<2x2x4x4xf32, #tpu.memory_space<vmem>>, vector<1x1x4x4xf32>
      %21 = vector.shape_cast %20 : vector<1x1x4x4xf32> to vector<4x4xf32>
      %22 = vector.shape_cast %19 : vector<4x4xf32> to vector<1x1x4x4xf32>
      tpu.vector_store %arg7[%c0_18, %c0_19, %c0_20, %c0_21], %22 {strides = array<i32>} : memref<2x2x4x4xf32, #tpu.memory_space<vmem>>, vector<1x1x4x4xf32>,
      %c0_22 = arith.constant 0 : index
      %c4 = arith.constant 4 : index
      %c4_23 = arith.constant 4 : index
      %23 = vector.load %arg8[%c0_22, %c4, %c4_23] : memref<2x8x8xf32, #tpu.memory_space<vmem>>, vector<1x4x4xf32>
      %24 = vector.shape_cast %23 : vector<1x4x4xf32> to vector<4x4xf32>
      %c0_24 = arith.constant 0 : index
      %c1 = arith.constant 1 : index
      %c0_25 = arith.constant 0 : index
      %c0_26 = arith.constant 0 : index
      %25 = vector.load %arg6[%c0_24, %c1, %c0_25, %c0_26] : memref<2x2x4x4xf32, #tpu.memory_space<vmem>>, vector<1x1x4x4xf32>
      %26 = vector.shape_cast %25 : vector<1x1x4x4xf32> to vector<4x4xf32>
      %27 = vector.shape_cast %24 : vector<4x4xf32> to vector<1x1x4x4xf32>
      tpu.vector_store %arg6[%c0_24, %c1, %c0_25, %c0_26], %27 {strides = array<i32>} : memref<2x2x4x4xf32, #tpu.memory_space<vmem>>, vector<1x1x4x4xf32>,
      %c0_27 = arith.constant 0 : index
      %c4_28 = arith.constant 4 : index
      %c4_29 = arith.constant 4 : index
      %28 = vector.load %arg9[%c0_27, %c4_28, %c4_29] : memref<2x8x8xf32, #tpu.memory_space<vmem>>, vector<1x4x4xf32>
      %29 = vector.shape_cast %28 : vector<1x4x4xf32> to vector<4x4xf32>
      %c0_30 = arith.constant 0 : index
      %c1_31 = arith.constant 1 : index
      %c0_32 = arith.constant 0 : index
      %c0_33 = arith.constant 0 : index
      %30 = vector.load %arg7[%c0_30, %c1_31, %c0_32, %c0_33] : memref<2x2x4x4xf32, #tpu.memory_space<vmem>>, vector<1x1x4x4xf32>
      %31 = vector.shape_cast %30 : vector<1x1x4x4xf32> to vector<4x4xf32>
      %32 = vector.shape_cast %29 : vector<4x4xf32> to vector<1x1x4x4xf32>
      tpu.vector_store %arg7[%c0_30, %c1_31, %c0_32, %c0_33], %32 {strides = array<i32>} : memref<2x2x4x4xf32, #tpu.memory_space<vmem>>, vector<1x1x4x4xf32>,
      %c1_34 = arith.constant 1 : index
      %c0_35 = arith.constant 0 : index
      %c0_36 = arith.constant 0 : index
      %33 = vector.load %arg8[%c1_34, %c0_35, %c0_36] : memref<2x8x8xf32, #tpu.memory_space<vmem>>, vector<1x4x4xf32>
      %34 = vector.shape_cast %33 : vector<1x4x4xf32> to vector<4x4xf32>
      %c1_37 = arith.constant 1 : index
      %c0_38 = arith.constant 0 : index
      %c0_39 = arith.constant 0 : index
      %c0_40 = arith.constant 0 : index
      %35 = vector.load %arg6[%c1_37, %c0_38, %c0_39, %c0_40] : memref<2x2x4x4xf32, #tpu.memory_space<vmem>>, vector<1x1x4x4xf32>
      %36 = vector.shape_cast %35 : vector<1x1x4x4xf32> to vector<4x4xf32>
      %37 = vector.shape_cast %34 : vector<4x4xf32> to vector<1x1x4x4xf32>
      tpu.vector_store %arg6[%c1_37, %c0_38, %c0_39, %c0_40], %37 {strides = array<i32>} : memref<2x2x4x4xf32, #tpu.memory_space<vmem>>, vector<1x1x4x4xf32>,
      %c1_41 = arith.constant 1 : index
      %c0_42 = arith.constant 0 : index
      %c0_43 = arith.constant 0 : index
      %38 = vector.load %arg9[%c1_41, %c0_42, %c0_43] : memref<2x8x8xf32, #tpu.memory_space<vmem>>, vector<1x4x4xf32>
      %39 = vector.shape_cast %38 : vector<1x4x4xf32> to vector<4x4xf32>
      %c1_44 = arith.constant 1 : index
      %c0_45 = arith.constant 0 : index
      %c0_46 = arith.constant 0 : index
      %c0_47 = arith.constant 0 : index
      %40 = vector.load %arg7[%c1_44, %c0_45, %c0_46, %c0_47] : memref<2x2x4x4xf32, #tpu.memory_space<vmem>>, vector<1x1x4x4xf32>
      %41 = vector.shape_cast %40 : vector<1x1x4x4xf32> to vector<4x4xf32>
      %42 = vector.shape_cast %39 : vector<4x4xf32> to vector<1x1x4x4xf32>
      tpu.vector_store %arg7[%c1_44, %c0_45, %c0_46, %c0_47], %42 {strides = array<i32>} : memref<2x2x4x4xf32, #tpu.memory_space<vmem>>, vector<1x1x4x4xf32>,
      %c1_48 = arith.constant 1 : index
      %c4_49 = arith.constant 4 : index
      %c4_50 = arith.constant 4 : index
      %43 = vector.load %arg8[%c1_48, %c4_49, %c4_50] : memref<2x8x8xf32, #tpu.memory_space<vmem>>, vector<1x4x4xf32>
      %44 = vector.shape_cast %43 : vector<1x4x4xf32> to vector<4x4xf32>
      %c1_51 = arith.constant 1 : index
      %c1_52 = arith.constant 1 : index
      %c0_53 = arith.constant 0 : index
      %c0_54 = arith.constant 0 : index
      %45 = vector.load %arg6[%c1_51, %c1_52, %c0_53, %c0_54] : memref<2x2x4x4xf32, #tpu.memory_space<vmem>>, vector<1x1x4x4xf32>
      %46 = vector.shape_cast %45 : vector<1x1x4x4xf32> to vector<4x4xf32>
      %47 = vector.shape_cast %44 : vector<4x4xf32> to vector<1x1x4x4xf32>
      tpu.vector_store %arg6[%c1_51, %c1_52, %c0_53, %c0_54], %47 {strides = array<i32>} : memref<2x2x4x4xf32, #tpu.memory_space<vmem>>, vector<1x1x4x4xf32>,
      %c1_55 = arith.constant 1 : index
      %c4_56 = arith.constant 4 : index
      %c4_57 = arith.constant 4 : index
      %48 = vector.load %arg9[%c1_55, %c4_56, %c4_57] : memref<2x8x8xf32, #tpu.memory_space<vmem>>, vector<1x4x4xf32>
      %49 = vector.shape_cast %48 : vector<1x4x4xf32> to vector<4x4xf32>
      %c1_58 = arith.constant 1 : index
      %c1_59 = arith.constant 1 : index
      %c0_60 = arith.constant 0 : index
      %c0_61 = arith.constant 0 : index
      %50 = vector.load %arg7[%c1_58, %c1_59, %c0_60, %c0_61] : memref<2x2x4x4xf32, #tpu.memory_space<vmem>>, vector<1x1x4x4xf32>
      %51 = vector.shape_cast %50 : vector<1x1x4x4xf32> to vector<4x4xf32>
      %52 = vector.shape_cast %49 : vector<4x4xf32> to vector<1x1x4x4xf32>
      tpu.vector_store %arg7[%c1_58, %c1_59, %c0_60, %c0_61], %52 {strides = array<i32>} : memref<2x2x4x4xf32, #tpu.memory_space<vmem>>, vector<1x1x4x4xf32>,
    } else {
    }
    return
  }
  func.func @transform_0(%arg0: i32, %arg1: i32) -> (i32, i32) {
    %c0_i32 = arith.constant 0 : i32
    %c0_i32_0 = arith.constant 0 : i32
    return %arg0, %c0_i32 : i32, i32
  }
  func.func @transform_1(%arg0: i32, %arg1: i32) -> (i32, i32) {
    %c0_i32 = arith.constant 0 : i32
    %c0_i32_0 = arith.constant 0 : i32
    return %c0_i32, %arg1 : i32, i32
  }
  func.func @transform_2(%arg0: i32, %arg1: i32) -> (i32, i32, i32) {
    %c0_i32 = arith.constant 0 : i32
    %c0_i32_0 = arith.constant 0 : i32
    %c0_i32_1 = arith.constant 0 : i32
    return %c0_i32, %c0_i32_0, %arg1 : i32, i32, i32
  }
  func.func @transform_3(%arg0: i32, %arg1: i32) -> (i32, i32, i32) {
    %c0_i32 = arith.constant 0 : i32
    %c0_i32_0 = arith.constant 0 : i32
    %c0_i32_1 = arith.constant 0 : i32
    return %c0_i32, %c0_i32_0, %arg1 : i32, i32, i32
  }
  func.func @transform_4(%arg0: i32, %arg1: i32) -> (i32, i32, i32, i32) {
    %c0_i32 = arith.constant 0 : i32
    %c0_i32_0 = arith.constant 0 : i32
    %c0_i32_1 = arith.constant 0 : i32
    %c0_i32_2 = arith.constant 0 : i32
    return %c0_i32, %arg0, %c0_i32_0, %c0_i32_1 : i32, i32, i32, i32
  }
  func.func @transform_5(%arg0: i32, %arg1: i32) -> (i32, i32, i32, i32) {
    %c0_i32 = arith.constant 0 : i32
    %c0_i32_0 = arith.constant 0 : i32
    %c0_i32_1 = arith.constant 0 : i32
    %c0_i32_2 = arith.constant 0 : i32
    return %c0_i32, %arg0, %c0_i32_0, %c0_i32_1 : i32, i32, i32, i32
  }
}

</mosaic_0001>

<bundles_post_ra>
// kernel: tpu_custom_call.1
= control target key start
LH: loop header
LB: loop body
LE: loop exit
PB: predicated region body
PF: predicated region fallthrough
CT: control target
= control target key end

     0   :  { %11 = vsyncpa [#allocation5], 0  ;;  %s582_s0 = inlined_call_operand.hbm [shape: f32[8,16], index: 0, kind: input, shape index: {}]   ;;  %s583_s1 = inlined_call_operand.hbm [shape: bf16[16,256], index: 1, kind: input, shape index: {}]   ;;  %s584_s2 = inlined_call_operand.hbm [shape: f32[2,1,128], index: 2, kind: input, shape index: {}]   ;;  %s585_s3 = inlined_call_operand.vmem [shape: f32[2,1,128], index: 3, kind: input, shape index: {}]   ;;  %s586_s4 = inlined_call_operand.hbm [shape: f32[2,2,4,4], index: 4, kind: output, shape index: {0}]   ;;  %s587_s5 = inlined_call_operand.hbm [shape: f32[2,2,4,4], index: 5, kind: output, shape index: {1}]  }
   0x1   :  { %12 = vsyncpa [#allocation8], 0 }
   0x2   :  { %13 = vsyncpa [#allocation6], 0  ;;  %s30_s20 = sshll.u32 %s583_s1, 4  ;;  %s31_s20 = int_to_ptr.hbm [resolvable:$true] %s30_s20 }
   0x3   :  { %14 = vsyncpa [#allocation12], 0  ;;  %s496_s21 = smov [#allocation7]   ;;  %s20_s25 = sshll.u32 %s582_s0, 4  ;;  %s21_s25 = int_to_ptr.hbm [resolvable:$true] %s20_s25 }
   0x4   :  { %s32_s22 = sshll.u32 %s496_s21, 4  ;;  %s497_s26 = smov 128   ;;  %s33_s22 = int_to_ptr.vmem [resolvable:$true] %s32_s22 }
   0x5   :  { %s498_s27 = smov 8   ;;  %s499_s28 = smov [#allocation4]  }
   0x6   :  { %38 = dma.hbm_to_vmem [thread:$0]  %s31_s20, 256, %s33_s22, [#allocation8], %s497_s26, %s497_s26, %s498_s27  }
   0x7   :  { %s22_s29 = sshll.u32 %s499_s28, 4  ;;  %s43_s7 = sshll.u32 %s584_s2, 4  ;;  %s23_s29 = int_to_ptr.vmem [resolvable:$true] %s22_s29  ;;  %s44_s7 = int_to_ptr.hbm [resolvable:$true] %s43_s7 }
   0x8   :  { %25 = dma.hbm_to_vmem [thread:$0]  %s21_s25, 128, %s23_s29, [#allocation5]  }
   0x9   :  { %s500_s1 = smov [#allocation9]   ;;  %s501_s9 = smov 16  }
   0xa   :  { %s45_s8 = sshll.u32 %s500_s1, 4  ;;  %s502_s10 = smov 1   ;;  %s46_s8 = int_to_ptr.vmem [resolvable:$true] %s45_s8 }
   0xb   :  { %51 = dma.hbm_to_vmem [thread:$0]  %s44_s7, 32, %s46_s8, [#allocation8], %s501_s9, %s501_s9, %s502_s10  }
   0xc   :  { %484 = dma.done.wait [#allocation5], 128  }
   0xd   :  { %485 = vsyncadd [#allocation5], 4294967168 }
   0xe   :  { %486 = dma.done.wait [#allocation8], 288  }
   0xf   :  { %487 = vsyncadd [#allocation8], 4294967008  ;;  %vm71_vm0 = vcmask 64512   ;;  %v503_v0 = vmov 0.0   ;;  %v322_v1 = vld [vmem:[#allocation7] sm:$0xf] }
  0x10   :  { %72 = vst.msk [vmem:[#allocation2] sm:$0xff] %vm71_vm0, %v503_v0  ;;  %v332_v2 = vld [vmem:[#allocation7 + $0x4] sm:$0xf0]  ;;  %v331_v3 = vld [vmem:[#allocation7 + $0x4] sm:$0xf]  ;;  %v76_v6 = vld [vmem:[#allocation4] sm:$0xff] }
  0x11   :  { %73 = vst.msk [vmem:[#allocation2 + $0x8] sm:$0xff] %vm71_vm0, %v503_v0  ;;  %v323_v4 = vor.u32 %v332_v2, %v322_v1  ;;  %v324_v5 = vld [vmem:[#allocation7 + $0x8] sm:$0xf0]  ;;  %v77_v8 = vpack.c.bf16 %v76_v6, %v76_v6  ;;  %vm90_vm1 = vcmask 130048   ;;  %s552_s0 = smov 0  }
  0x12   :  { %74 = vst.msk [vmem:[#allocation3] sm:$0xff] %vm71_vm0, %v503_v0  ;;  %v327_v7 = vor.u32 %v331_v3, %v324_v5 }
  0x13   :  { %75 = vst.msk [vmem:[#allocation3 + $0x8] sm:$0xff] %vm71_vm0, %v503_v0  ;;  %101 = vmatpush.bf16.msra.mxu0 %v323_v4 }
  0x14   :  { %114 = vmatpush.bf16.msra.mxu1 %v327_v7 }
  0x16   :  { %328 = vmatmul.msk.bf16.vlgmr.msra.gmra.mxu0 %vm90_vm1, %v77_v8 }
  0x17   :  { %329 = vmatmul.msk.bf16.vlgmr.msra.gmra.mxu1 %vm90_vm1, %v77_v8 }
  0x93   :  { %v103_v9 = vpop.f32.mrf.mxu0 }
  0x94   :  { %v116_v10 = vpop.f32.mrf.mxu1 }
  0x9b   :  { %v105_v11 = vpop.f32.mrf.mxu0 }
  0x9c   :  { %v118_v12 = vpop.f32.mrf.mxu1 }
  0x9d LB: > { %s128_s12 = scalar_lea.vmem %s585_s3, %s494_s0  ;;  %s126_s13 = scalar_lea.vmem [#allocation9], %s494_s0  ;;  %s494_s0 = sphi %s552_s0, %s125_s0  }
  0x9e   : > { %v354_v13 = vld [vmem:[%s126_s13] ss:$0 sm:$0xff]  ;;  %s330_s14 = sshll.u32 %s494_s0, 3  ;;  %s125_s0 = sadd.s32 1, %s494_s0  }
  0x9f   : > { %v355_v14 = vld [vmem:[%s128_s12] ss:$0 sm:$0xff]  ;;  %v133_v15 = vmul.f32 %v354_v13, %v103_v9  ;;  %s218_s15 = scalar_lea.vmem [#allocation2], %s330_s14  ;;  %s223_s16 = scalar_lea.vmem [#allocation3], %s330_s14 }
  0xa0   : > { %v137_v16 = vmul.f32 %v355_v14, %v116_v10  ;;  %v219_v36 = vld [vmem:[%s218_s15] sm:$0xff]  ;;  %p122_p0 = scmp.ge.s32.totalorder %s125_s0, 2  }
  0xa1   : > { %v138_v17 = vmul.f32 %v133_v15, %v133_v15  ;;  %v224_v39 = vld [vmem:[%s223_s16] sm:$0xff]  ;;  %s504_s17 = smov (%p122_p0), 124   ;;  %vm231_vm4 = vcmask (%p122_p0), 27648   ;;  %s505_s3 = smov (%p122_p0), [#allocation10]  }
  0xa2   : > { %v139_v18 = vmul.f32 %v137_v16, %v137_v16  ;;  %s275_s18 = sshll.u32 (%p122_p0), %s505_s3, 4  ;;  %s277_s21 = sshll.u32 (%p122_p0), %s586_s4, 4  ;;  %s276_s18 = int_to_ptr.vmem [resolvable:$true] %s275_s18  ;;  %s278_s21 = int_to_ptr.hbm [resolvable:$true] %s277_s21 }
  0xa3   :  { %s506_s22 = smov (%p122_p0), 64   ;;  %s507_s23 = smov (%p122_p0), 4  }
  0xa4   : > { %v140_v19 = vadd.f32 %v139_v18, %v138_v17  ;;  %s508_s24 = smov (%p122_p0), [#allocation11]   ;;  %s290_s28 = sshll.u32 (%p122_p0), %s587_s5, 4  ;;  %s291_s28 = int_to_ptr.hbm [resolvable:$true] %s290_s28 }
  0xa5   :  { %s288_s25 = sshll.u32 (%p122_p0), %s508_s24, 4  ;;  %s289_s25 = int_to_ptr.vmem [resolvable:$true] %s288_s25 }
  0xa6   : > { %356 = vrsqrt.f32 %v140_v19  ;;  %vm148_vm2 = vcmp.eq.f32.partialorder %v140_v19, inf  ;;  %v151_v26 = vand.u32 2147483648, %v140_v19  ;;  %vm150_vm3 = vcmp.eq.f32.partialorder %v140_v19, 0.0 }
  0xac   : > { %v357_v20 = vpop.eup %356 }
  0xad   : > { %v142_v21 = vmul.f32 %v357_v20, %v140_v19 }
  0xaf   : > { %v143_v22 = vmul.f32 %v357_v20, %v142_v21 }
  0xb1   : > { %v144_v23 = vmul.f32 0.5, %v143_v22 }
  0xb3   : > { %v145_v24 = vsub.f32 1.5, %v144_v23 }
  0xb5   : > { %v146_v25 = vmul.f32 %v357_v20, %v145_v24 }
  0xb7   : > { %v147_v27 = vmul.f32 %v146_v25, %v140_v19 }
  0xb9   : > { %v149_v28 = vsel %vm148_vm2, %v140_v19, %v147_v27 }
  0xba   : > { %v152_v29 = vsel %vm150_vm3, %v151_v26, %v149_v28 }
  0xbb   : > { %v153_v30 = vadd.f32 1e-06, %v152_v29 }
  0xbd   : > { %358 = vrcp.f32 %v153_v30 }
  0xc3   : > { %v359_v31 = vpop.eup %358 }
  0xc4   : > { %v155_v32 = vmul.f32 %v359_v31, %v133_v15  ;;  %v156_v33 = vmul.f32 %v359_v31, %v137_v16 }
  0xc6   : > { %212 = vmatpush.xpose.msra.mxu2 %v155_v32  ;;  %172 = vmatpush.xpose.msra.mxu0 %v156_v33 }
  0xc7   : > { %192 = vmatpush.xpose.msra.mxu1 %v155_v32 }
  0xc9   : > { %213 = vmatmul.f32.vlgmr.msra.gmra.mxu2 %v156_v33  ;;  %173 = vmatmul.f32.vlgmr.msra.gmra.mxu0 %v156_v33 }
  0xca   : > { %193 = vmatmul.f32.vlgmr.msra.gmra.mxu1 %v155_v32 }
 0x146   : > { %v174_v34 = vpop.f32.mrf.mxu0 }
 0x147   : > { %v194_v35 = vpop.f32.mrf.mxu1 }
 0x148   : > { %v195_v37 = vadd.f32 %v194_v35, %v174_v34 }
 0x14a   : > { %v220_v38 = vadd.f32 %v219_v36, %v195_v37 }
 0x14c   : > { %222 = vst.msk [vmem:[%s218_s15] sm:$0xff] %vm71_vm0, %v220_v38  ;;  %v214_v40 = vpop.f32.mrf.mxu2 }
 0x14d   : > { %v225_v41 = vadd.f32 %v224_v39, %v214_v40 }
 0x14e   :  { %124 = sbr.rel (!%p122_p0) target bundleno = 157 (0x9d), region = 83 }
 0x14f   : > { %226 = vst.msk [vmem:[%s223_s16] sm:$0xff] %vm71_vm0, %v225_v41 }
 0x153   :  { %v257_v42 = vld [vmem:[#allocation2 + $0xc] sm:$0xf]  ;;  %v235_v43 = vld [vmem:[#allocation2 + $0x4] sm:$0xf]  ;;  %v230_v46 = vld [vmem:[#allocation2] sm:$0xf] }
 0x154   :  { %259 = vrot.lane.b32.xlu1 %v257_v42, %s504_s17  ;;  %237 = vrot.lane.b32.xlu0 %v235_v43, %s504_s17  ;;  %v250_v47 = vld [vmem:[#allocation2 + $0x8] sm:$0xf]  ;;  %232 = vst.msk [vmem:[#allocation10] sm:$0xf] %vm231_vm4, %v230_v46 }
 0x155   :  { %252 = vst.msk [vmem:[#allocation10 + $0x8] sm:$0xf] %vm231_vm4, %v250_v47 }
 0x156   :  { %v264_v44 = vld [vmem:[#allocation3 + $0xc] sm:$0xf]  ;;  %v242_v45 = vld [vmem:[#allocation3 + $0x4] sm:$0xf]  ;;  %v233_v48 = vld [vmem:[#allocation3] sm:$0xf] }
 0x157   :  { %v254_v49 = vld [vmem:[#allocation3 + $0x8] sm:$0xf]  ;;  %234 = vst.msk [vmem:[#allocation11] sm:$0xf] %vm231_vm4, %v233_v48 }
 0x158   :  { %256 = vst.msk [vmem:[#allocation11 + $0x8] sm:$0xf] %vm231_vm4, %v254_v49 }
 0x15c   :  { %266 = vrot.lane.b32.xlu1 %v264_v44, %s504_s17  ;;  %244 = vrot.lane.b32.xlu0 %v242_v45, %s504_s17 }
 0x1c6   :  { %v260_v50 = vpop.permute.xlu1 %259  ;;  %v238_v51 = vpop.permute.xlu0 %237 }
 0x1c7   :  { %263 = vst.msk [vmem:[#allocation10 + $0xc] sm:$0xf] %vm231_vm4, %v260_v50 }
 0x1c8   :  { %241 = vst.msk [vmem:[#allocation10 + $0x4] sm:$0xf] %vm231_vm4, %v238_v51 }
 0x1c9   :  { %283 = dma.vmem_to_hbm [thread:$0]  %s276_s18, 256, %s278_s21, [#allocation6], %s506_s22, %s506_s22, %s507_s23  }
 0x1ce   :  { %v267_v52 = vpop.permute.xlu1 %266  ;;  %v245_v53 = vpop.permute.xlu0 %244 }
 0x1cf   :  { %270 = vst.msk [vmem:[#allocation11 + $0xc] sm:$0xf] %vm231_vm4, %v267_v52 }
 0x1d0   :  { %248 = vst.msk [vmem:[#allocation11 + $0x4] sm:$0xf] %vm231_vm4, %v245_v53 }
 0x1d1   :  { %296 = dma.vmem_to_hbm [thread:$0]  %s289_s25, 256, %s291_s28, [#allocation12], %s506_s22, %s506_s22, %s507_s23  }
 0x1d2   :  { %488 = dma.done.wait [#allocation6], 256  }
 0x1d3   :  { %489 = vsyncadd [#allocation6], 4294967040 }
 0x1d4   :  { %490 = dma.done.wait [#allocation12], 256  }
 0x1d5   :  { %491 = vsyncadd [#allocation12], 4294967040 }
 0x1d6   :  { %305 = vsyncpa [#allocation5], 1 }
 0x1d7   :  { %306 = vsyncpa [#allocation8], 1 }
 0x1d8   :  { %307 = vsyncpa [#allocation6], 1 }
 0x1d9   :  { %308 = vsyncpa [#allocation12], 1 }

</bundles_post_ra>
